<compile_context>
chip_gen: v5e
topology: v5e:2x2
jax: 0.10.0
libtpu: 0.0.40
codegen_flags: <defaults>
</compile_context>

<pallas_src>
import functools

import jax
import jax.numpy as jnp
from jax.experimental import pallas as pl
from jax.experimental.pallas import tpu as pltpu

LANE = 128


def _round_up(x, m):
    return ((x + m - 1) // m) * m


def _gee_kernel(x_ref, w1_ref, b1_ref, w2_ref, b2_ref, out_ref, acc_ref, *,
                n, tile_n, steps_per_core, mask_rows):
    c = pl.program_id(0)          # core-split axis ("parallel")
    i = pl.program_id(1)          # entity-reduction axis ("arbitrary")

    @pl.when(i == 0)
    def _init():
        acc_ref[...] = jnp.full(acc_ref.shape, -jnp.inf, dtype=acc_ref.dtype)

    # Two MXU matmuls with f32 accumulation; bias / ReLU on the VPU in f32.
    x = x_ref[...]                                                    # (tile_n, in_dim)
    h = jnp.dot(x, w1_ref[...], preferred_element_type=jnp.float32)   # (tile_n, hid)
    h = jnp.maximum(h + b1_ref[...], 0.0)
    y = jnp.dot(h.astype(w2_ref.dtype), w2_ref[...],
                preferred_element_type=jnp.float32)                   # (tile_n, out)
    y = y + b2_ref[...]

    # Mask rows past N with -inf BEFORE the max (handles the partial last block
    # and any fully out-of-range duplicated block from the core split).
    if mask_rows:
        row_start = (c * steps_per_core + i) * tile_n
        rows = jax.lax.broadcasted_iota(jnp.int32, y.shape, 0) + row_start
        y = jnp.where(rows < n, y, -jnp.inf)

    # Sublane-group partial max: reduce over the leading axis of the
    # (tile_n//8, 8, out) view -> pure elementwise (VPU) maxima, no XLU.
    part = jnp.max(y.reshape(tile_n // 8, 8, y.shape[-1]), axis=0)    # (8, out)
    acc_ref[...] = jnp.maximum(acc_ref[...], part)

    # Single cross-sublane (XLU) reduce + store per core, on the last step.
    @pl.when(i == pl.num_programs(1) - 1)
    def _finalize():
        out_ref[...] = jnp.max(acc_ref[...], axis=0, keepdims=True)[None]


def gee_forward(entity_states, w1, b1, w2, b2, *,
                matmul_dtype=jnp.float32, max_tile_n=2048, num_core_splits=2):
    """entity_states: (N, input_dim) f32; w1: (input_dim, hidden);
    b1: (hidden,)/(1, hidden); w2: (hidden, output); b2: (output,)/(1, output).
    Returns (output_dim,) f32 — max over entities of the 2-layer MLP.

    matmul_dtype=jnp.bfloat16 halves the streamed HBM bytes of x but quantizes
    the input activations (~1e-2 relative)."""
    n, in_dim = entity_states.shape
    hid_dim = w1.shape[1]
    out_dim = w2.shape[1]

    # Entity-axis tile: multiple of 8 (f32) / 16 (bf16) sublanes, big by default
    # to amortize the per-grid-step overhead.
    align = 16 if jnp.dtype(matmul_dtype) == jnp.dtype(jnp.bfloat16) else 8
    tile_n = min(_round_up(max_tile_n, align), _round_up(n, align))

    tiles = -(-n // tile_n)                        # ceil-div
    num_cores = max(1, min(num_core_splits, tiles))
    spc = -(-tiles // num_cores)                   # reduction steps per core
    covered = num_cores * spc * tile_n
    mask_rows = covered != n
    last_block = tiles - 1

    x = (entity_states if entity_states.dtype == jnp.dtype(matmul_dtype)
         else entity_states.astype(matmul_dtype))
    w1c = w1.astype(matmul_dtype)
    w2c = w2.astype(matmul_dtype)
    b1c = jnp.reshape(b1, (1, hid_dim)).astype(jnp.float32)
    b2c = jnp.reshape(b2, (1, out_dim)).astype(jnp.float32)

    # VMEM budget (lane-padded in-VMEM sizes), with headroom; cap for v7x.
    itemsize = jnp.dtype(matmul_dtype).itemsize
    in_l, hid_l, out_l = (_round_up(d, LANE) for d in (in_dim, hid_dim, out_dim))
    vmem_bytes = (2 * tile_n * in_l * itemsize                      # x double-buffer
                  + 2 * (in_l * hid_l + hid_l * out_l) * itemsize   # resident weights
                  + tile_n * (hid_l + out_l) * 4                    # h / y temporaries
                  + (hid_l + out_l + 8 * out_l + 8 * out_l) * 4)    # biases, acc, out
    vmem_limit = int(min(max(2 * vmem_bytes, 8 << 20), 48 << 20))

    kernel = functools.partial(_gee_kernel, n=n, tile_n=tile_n,
                               steps_per_core=spc, mask_rows=mask_rows)

    # Clamp the block index so no block starts entirely past the array; clamped
    # duplicates are masked to -inf in-kernel via the (unclamped) row_start.
    x_index_map = lambda c, i: (jnp.minimum(c * spc + i, last_block), 0)

    out = pl.pallas_call(
        kernel,
        out_shape=jax.ShapeDtypeStruct((num_cores, 1, out_dim), jnp.float32),
        grid_spec=pltpu.PrefetchScalarGridSpec(
            num_scalar_prefetch=0,
            grid=(num_cores, spc),
            in_specs=[
                pl.BlockSpec((tile_n, in_dim), x_index_map),            # streamed x
                pl.BlockSpec((in_dim, hid_dim), lambda c, i: (0, 0)),   # resident w1
                pl.BlockSpec((1, hid_dim), lambda c, i: (0, 0)),        # resident b1
                pl.BlockSpec((hid_dim, out_dim), lambda c, i: (0, 0)),  # resident w2
                pl.BlockSpec((1, out_dim), lambda c, i: (0, 0)),        # resident b2
            ],
            out_specs=pl.BlockSpec((1, 1, out_dim), lambda c, i: (c, 0, 0)),
            scratch_shapes=[pltpu.VMEM((8, out_dim), jnp.float32)],     # running max
        ),
        compiler_params=pltpu.CompilerParams(
            dimension_semantics=("parallel", "arbitrary"),
            vmem_limit_bytes=vmem_limit,
        ),
        cost_estimate=pl.CostEstimate(
            flops=int(2 * n * (in_dim * hid_dim + hid_dim * out_dim)),
            transcendentals=0,
            bytes_accessed=int(n * in_dim * itemsize
                               + (w1c.size + w2c.size) * itemsize
                               + (b1c.size + b2c.size) * 4
                               + num_cores * out_dim * 4),
        ),
    )(x, w1c, b1c, w2c, b2c)

    # Combine the per-core partial maxima (cheap: (num_cores, out_dim)).
    return jnp.max(out[:, 0, :], axis=0)


def init_params(key, input_dim, hidden_dim, output_dim):
    k1, k2, k3, k4 = jax.random.split(key, 4)
    # nn.Linear-style uniform init; weights stored as (in, out).
    lim1 = 1.0 / jnp.sqrt(input_dim)
    lim2 = 1.0 / jnp.sqrt(hidden_dim)
    w1 = jax.random.uniform(k1, (input_dim, hidden_dim), jnp.float32, -lim1, lim1)
    b1 = jax.random.uniform(k2, (1, hidden_dim), jnp.float32, -lim1, lim1)
    w2 = jax.random.uniform(k3, (hidden_dim, output_dim), jnp.float32, -lim2, lim2)
    b2 = jax.random.uniform(k4, (1, output_dim), jnp.float32, -lim2, lim2)
    return w1, b1, w2, b2


def _reference(x, w1, b1, w2, b2):
    return jnp.max(jnp.maximum(x @ w1 + b1, 0.0) @ w2 + b2, axis=0)


if __name__ == "__main__":
    INPUT_DIM, HIDDEN_DIM, OUTPUT_DIM = 32, 32, 32
    key = jax.random.PRNGKey(0)
    kx1, kx2, kx3, kp = jax.random.split(key, 4)
    w1, b1, w2, b2 = init_params(kp, INPUT_DIM, HIDDEN_DIM, OUTPUT_DIM)

    # 1) Toy size from the module spec (N=8): single tile, single core, f32 exact.
    x_small = jax.random.normal(kx1, (8, INPUT_DIM), jnp.float32)
    out_small = gee_forward(x_small, w1, b1, w2, b2)
    jax.block_until_ready(out_small)
    assert out_small.shape == (OUTPUT_DIM,)
    assert jnp.allclose(out_small, _reference(x_small, w1, b1, w2, b2),
                        atol=1e-4, rtol=1e-4)

    # 2) N=200 with a small tile: multi-step reduction, 2-way core split,
    #    in-kernel -inf masking of the partial last block.
    x_mid = jax.random.normal(kx2, (200, INPUT_DIM), jnp.float32)
    out_mid = gee_forward(x_mid, w1, b1, w2, b2, max_tile_n=64)
    jax.block_until_ready(out_mid)
    assert jnp.allclose(out_mid, _reference(x_mid, w1, b1, w2, b2),
                        atol=1e-4, rtol=1e-4)

    # 3) Larger N with the default 2048-row tile (amortized step overhead).
    x_big = jax.random.normal(kx3, (3000, INPUT_DIM), jnp.float32)
    ref_big = _reference(x_big, w1, b1, w2, b2)
    out_big = gee_forward(x_big, w1, b1, w2, b2)
    jax.block_until_ready(out_big)
    assert jnp.allclose(out_big, ref_big, atol=1e-4, rtol=1e-4)

    # 4) bf16 streaming path (halves x HBM bytes; quantizes inputs -> loose tol).
    out_bf16 = gee_forward(x_big, w1, b1, w2, b2, matmul_dtype=jnp.bfloat16)
    jax.block_until_ready(out_bf16)
    assert jnp.allclose(out_bf16, ref_big, atol=5e-2, rtol=5e-2)

    print("KERNEL_OK")
</pallas_src>

<mosaic_0001>
module attributes {stable_mosaic.version = 11 : i64} {
  func.func @_gee_kernel(%arg0: i32, %arg1: i32, %arg2: memref<8x32xf32, #tpu.memory_space<vmem>>, %arg3: memref<32x32xf32, #tpu.memory_space<vmem>>, %arg4: memref<1x32xf32, #tpu.memory_space<vmem>>, %arg5: memref<32x32xf32, #tpu.memory_space<vmem>>, %arg6: memref<1x32xf32, #tpu.memory_space<vmem>>, %arg7: memref<1x1x32xf32, #tpu.memory_space<vmem>>, %arg8: memref<8x32xf32, #tpu.memory_space<vmem>>) attributes {dimension_semantics = [#tpu.dimension_semantics<parallel>, #tpu.dimension_semantics<arbitrary>], iteration_bounds = array<i64: 1, 1>, scalar_prefetch = 0 : i64, scratch_operands = 1 : i64, tpu.core_type = #tpu.core_type<tc>, window_params = [{transform_indices = @transform_0, window_bounds = array<i64: 8, 32>}, {pipeline_mode = #tpu.pipeline_mode<synchronous>, transform_indices = @transform_1, window_bounds = array<i64: 32, 32>}, {pipeline_mode = #tpu.pipeline_mode<synchronous>, transform_indices = @transform_2, window_bounds = array<i64: 1, 32>}, {pipeline_mode = #tpu.pipeline_mode<synchronous>, transform_indices = @transform_3, window_bounds = array<i64: 32, 32>}, {pipeline_mode = #tpu.pipeline_mode<synchronous>, transform_indices = @transform_4, window_bounds = array<i64: 1, 32>}, {transform_indices = @transform_5, window_bounds = array<i64: 1, 1, 32>}]} {
    %c0_i32 = arith.constant 0 : i32
    %0 = arith.cmpi eq, %arg1, %c0_i32 : i32
    %1 = arith.extui %0 : i1 to i32
    %c0_i32_0 = arith.constant 0 : i32
    %2 = arith.cmpi ne, %1, %c0_i32_0 : i32
    scf.if %2 {
      %cst_19 = arith.constant 0xFF800000 : f32
      %24 = vector.broadcast %cst_19 : f32 to vector<8x32xf32>
      %c0_20 = arith.constant 0 : index
      %c0_21 = arith.constant 0 : index
      %25 = vector.load %arg8[%c0_20, %c0_21] : memref<8x32xf32, #tpu.memory_space<vmem>>, vector<8x32xf32>
      tpu.vector_store %arg8[%c0_20, %c0_21], %24 {strides = array<i32>} : memref<8x32xf32, #tpu.memory_space<vmem>>, vector<8x32xf32>,
    } else {
    }
    %c0 = arith.constant 0 : index
    %c0_1 = arith.constant 0 : index
    %3 = vector.load %arg2[%c0, %c0_1] : memref<8x32xf32, #tpu.memory_space<vmem>>, vector<8x32xf32>
    %c0_2 = arith.constant 0 : index
    %c0_3 = arith.constant 0 : index
    %4 = vector.load %arg3[%c0_2, %c0_3] : memref<32x32xf32, #tpu.memory_space<vmem>>, vector<32x32xf32>
    %cst = arith.constant dense<0.000000e+00> : vector<8x32xf32>
    %5 = tpu.matmul %3, %4, %cst {dimension_numbers = #tpu.dot_dimension_numbers<[1], [0], [0], [1], [0, 0, 1, 1], [], []>} : vector<8x32xf32>, vector<32x32xf32>, vector<8x32xf32> -> vector<8x32xf32>
    %c0_4 = arith.constant 0 : index
    %c0_5 = arith.constant 0 : index
    %6 = vector.load %arg4[%c0_4, %c0_5] : memref<1x32xf32, #tpu.memory_space<vmem>>, vector<1x32xf32>
    %7 = vector.broadcast %6 : vector<1x32xf32> to vector<8x32xf32>
    %8 = arith.addf %5, %7 : vector<8x32xf32>
    %cst_6 = arith.constant 0.000000e+00 : f32
    %9 = vector.broadcast %cst_6 : f32 to vector<8x32xf32>
    %10 = arith.maximumf %8, %9 : vector<8x32xf32>
    %c0_7 = arith.constant 0 : index
    %c0_8 = arith.constant 0 : index
    %11 = vector.load %arg5[%c0_7, %c0_8] : memref<32x32xf32, #tpu.memory_space<vmem>>, vector<32x32xf32>
    %cst_9 = arith.constant dense<0.000000e+00> : vector<8x32xf32>
    %12 = tpu.matmul %10, %11, %cst_9 {dimension_numbers = #tpu.dot_dimension_numbers<[1], [0], [0], [1], [0, 0, 1, 1], [], []>} : vector<8x32xf32>, vector<32x32xf32>, vector<8x32xf32> -> vector<8x32xf32>
    %c0_10 = arith.constant 0 : index
    %c0_11 = arith.constant 0 : index
    %13 = vector.load %arg6[%c0_10, %c0_11] : memref<1x32xf32, #tpu.memory_space<vmem>>, vector<1x32xf32>
    %14 = vector.broadcast %13 : vector<1x32xf32> to vector<8x32xf32>
    %15 = arith.addf %12, %14 : vector<8x32xf32>
    %16 = vector.shape_cast %15 : vector<8x32xf32> to vector<1x8x32xf32>
    %cst_12 = arith.constant dense<0xFF800000> : vector<8x32xf32>
    %17 = vector.multi_reduction <maximumf>, %16, %cst_12 [0] : vector<1x8x32xf32> to vector<8x32xf32>
    %c0_13 = arith.constant 0 : index
    %c0_14 = arith.constant 0 : index
    %18 = vector.load %arg8[%c0_13, %c0_14] : memref<8x32xf32, #tpu.memory_space<vmem>>, vector<8x32xf32>
    %19 = arith.maximumf %18, %17 : vector<8x32xf32>
    %c0_15 = arith.constant 0 : index
    %c0_16 = arith.constant 0 : index
    %20 = vector.load %arg8[%c0_15, %c0_16] : memref<8x32xf32, #tpu.memory_space<vmem>>, vector<8x32xf32>
    tpu.vector_store %arg8[%c0_15, %c0_16], %19 {strides = array<i32>} : memref<8x32xf32, #tpu.memory_space<vmem>>, vector<8x32xf32>,
    %c0_i32_17 = arith.constant 0 : i32
    %21 = arith.cmpi eq, %arg1, %c0_i32_17 : i32
    %22 = arith.extui %21 : i1 to i32
    %c0_i32_18 = arith.constant 0 : i32
    %23 = arith.cmpi ne, %22, %c0_i32_18 : i32
    scf.if %23 {
      %c0_19 = arith.constant 0 : index
      %c0_20 = arith.constant 0 : index
      %24 = vector.load %arg8[%c0_19, %c0_20] : memref<8x32xf32, #tpu.memory_space<vmem>>, vector<8x32xf32>
      %cst_21 = arith.constant dense<0xFF800000> : vector<32xf32>
      %25 = vector.multi_reduction <maximumf>, %24, %cst_21 [0] : vector<8x32xf32> to vector<32xf32>
      %26 = vector.shape_cast %25 : vector<32xf32> to vector<1x32xf32>
      %27 = vector.shape_cast %26 : vector<1x32xf32> to vector<1x1x32xf32>
      %c0_22 = arith.constant 0 : index
      %c0_23 = arith.constant 0 : index
      %c0_24 = arith.constant 0 : index
      %28 = vector.load %arg7[%c0_22, %c0_23, %c0_24] : memref<1x1x32xf32, #tpu.memory_space<vmem>>, vector<1x1x32xf32>
      tpu.vector_store %arg7[%c0_22, %c0_23, %c0_24], %27 {strides = array<i32>} : memref<1x1x32xf32, #tpu.memory_space<vmem>>, vector<1x1x32xf32>,
    } else {
    }
    return
  }
  func.func @transform_0(%arg0: i32, %arg1: i32) -> (i32, i32) {
    %c1_i32 = arith.constant 1 : i32
    %0 = arith.muli %arg0, %c1_i32 : i32
    %1 = arith.addi %0, %arg1 : i32
    %c0_i32 = arith.constant 0 : i32
    %2 = arith.minsi %1, %c0_i32 : i32
    %c0_i32_0 = arith.constant 0 : i32
    %c0_i32_1 = arith.constant 0 : i32
    return %2, %c0_i32_0 : i32, i32
  }
  func.func @transform_1(%arg0: i32, %arg1: i32) -> (i32, i32) {
    %c0_i32 = arith.constant 0 : i32
    %c0_i32_0 = arith.constant 0 : i32
    %c0_i32_1 = arith.constant 0 : i32
    return %c0_i32, %c0_i32_0 : i32, i32
  }
  func.func @transform_2(%arg0: i32, %arg1: i32) -> (i32, i32) {
    %c0_i32 = arith.constant 0 : i32
    %c0_i32_0 = arith.constant 0 : i32
    %c0_i32_1 = arith.constant 0 : i32
    return %c0_i32, %c0_i32_0 : i32, i32
  }
  func.func @transform_3(%arg0: i32, %arg1: i32) -> (i32, i32) {
    %c0_i32 = arith.constant 0 : i32
    %c0_i32_0 = arith.constant 0 : i32
    %c0_i32_1 = arith.constant 0 : i32
    return %c0_i32, %c0_i32_0 : i32, i32
  }
  func.func @transform_4(%arg0: i32, %arg1: i32) -> (i32, i32) {
    %c0_i32 = arith.constant 0 : i32
    %c0_i32_0 = arith.constant 0 : i32
    %c0_i32_1 = arith.constant 0 : i32
    return %c0_i32, %c0_i32_0 : i32, i32
  }
  func.func @transform_5(%arg0: i32, %arg1: i32) -> (i32, i32, i32) {
    %c0_i32 = arith.constant 0 : i32
    %c0_i32_0 = arith.constant 0 : i32
    %c0_i32_1 = arith.constant 0 : i32
    return %arg0, %c0_i32, %c0_i32_0 : i32, i32, i32
  }
}

</mosaic_0001>

<bundles_post_ra>
// kernel: tpu_custom_call.1
= control target key start
LH: loop header
LB: loop body
LE: loop exit
PB: predicated region body
PF: predicated region fallthrough
CT: control target
= control target key end

     0   :  { %10 = vsyncpa [#allocation4], 0  ;;  %s354_s0 = inlined_call_operand.hbm [shape: f32[8,32], index: 0, kind: input, shape index: {}]   ;;  %s355_s1 = inlined_call_operand.hbm [shape: f32[32,32], index: 1, kind: input, shape index: {}]   ;;  %s356_s2 = inlined_call_operand.vmem [shape: f32[1,32], index: 2, kind: input, shape index: {}]   ;;  %s357_s3 = inlined_call_operand.hbm [shape: f32[32,32], index: 3, kind: input, shape index: {}]   ;;  %s358_s4 = inlined_call_operand.vmem [shape: f32[1,32], index: 4, kind: input, shape index: {}]   ;;  %s359_s5 = inlined_call_operand.hbm [shape: f32[1,1,32], index: 5, kind: output, shape index: {}]  }
   0x1   :  { %11 = vsyncpa [#allocation7], 0  ;;  %s33_s20 = sshll.u32 %s355_s1, 4  ;;  %s34_s20 = int_to_ptr.hbm [resolvable:$true] %s33_s20 }
   0x2   :  { %12 = vsyncpa [#allocation5], 0  ;;  %s294_s21 = smov [#allocation6]   ;;  %s23_s25 = sshll.u32 %s354_s0, 4  ;;  %s24_s25 = int_to_ptr.hbm [resolvable:$true] %s23_s25 }
   0x3   :  { %s35_s22 = sshll.u32 %s294_s21, 4  ;;  %s295_s26 = smov 128   ;;  %s36_s22 = int_to_ptr.vmem [resolvable:$true] %s35_s22 }
   0x4   :  { %s296_s27 = smov 8   ;;  %s297_s28 = smov [#allocation3]  }
   0x5   :  { %41 = dma.hbm_to_vmem [thread:$0]  %s34_s20, 512, %s36_s22, [#allocation7], %s295_s26, %s295_s26, %s296_s27  }
   0x6   :  { %s25_s29 = sshll.u32 %s297_s28, 4  ;;  %s48_s7 = sshll.u32 %s357_s3, 4  ;;  %s26_s29 = int_to_ptr.vmem [resolvable:$true] %s25_s29  ;;  %s49_s7 = int_to_ptr.hbm [resolvable:$true] %s48_s7 }
   0x7   :  { %28 = dma.hbm_to_vmem [thread:$0]  %s24_s25, 128, %s26_s29, [#allocation4]  }
   0x8   :  { %s298_s1 = smov [#allocation8]  }
   0x9   :  { %s50_s8 = sshll.u32 %s298_s1, 4  ;;  %s51_s8 = int_to_ptr.vmem [resolvable:$true] %s50_s8 }
   0xa   :  { %56 = dma.hbm_to_vmem [thread:$0]  %s49_s7, 512, %s51_s8, [#allocation7], %s295_s26, %s295_s26, %s296_s27  }
   0xb   :  { %288 = dma.done.wait [#allocation4], 128  }
   0xc   :  { %289 = vsyncadd [#allocation4], 4294967168 }
   0xd   :  { %290 = dma.done.wait [#allocation7], 1024  }
   0xe   :  { %291 = vsyncadd [#allocation7], 4294966272  ;;  %vm78_vm0 = vcmask 261120   ;;  %v299_v0 = vmov -inf   ;;  %v84_v1 = vld [vmem:[#allocation6 + $0x18] sm:$0xff]  ;;  %v83_v2 = vld [vmem:[#allocation6 + $0x10] sm:$0xff] }
   0xf   :  { %79 = vst.msk [vmem:[#allocation2] sm:$0xff] %vm78_vm0, %v299_v0  ;;  %105 = vmatpush.msra.mxu0 %v84_v1  ;;  %v117_v3 = vld [vmem:[#allocation8 + $0x18] sm:$0xff]  ;;  %v82_v4 = vld [vmem:[#allocation6 + $0x8] sm:$0xff]  ;;  %v81_v5 = vld [vmem:[#allocation6] sm:$0xff]  ;;  %s168_s14 = sshll.u32 %s359_s5, 4  ;;  %vm159_vm1 = vcmask 253952   ;;  %s169_s14 = int_to_ptr.hbm [resolvable:$true] %s168_s14 }
  0x10   :  { %137 = vmatpush.msra.mxu1 %v117_v3  ;;  %v80_v6 = vld [vmem:[#allocation3] sm:$0xff]  ;;  %v116_v7 = vld [vmem:[#allocation8 + $0x10] sm:$0xff]  ;;  %v115_v8 = vld [vmem:[#allocation8 + $0x8] sm:$0xff] }
  0x11   :  { %106 = vmatpush.msra.mxu0 %v83_v2  ;;  %v114_v9 = vld [vmem:[#allocation8] sm:$0xff]  ;;  %v190_v10 = vld [vmem:[%s356_s2] ss:$0 sm:$0xff]  ;;  %s300_s2 = smov [#allocation9]  }
  0x12   :  { %138 = vmatpush.msra.mxu1 %v116_v7  ;;  %v191_v14 = vld [vmem:[%s358_s4] ss:$0 sm:$0xff]  ;;  %s166_s11 = sshll.u32 %s300_s2, 4  ;;  %s167_s11 = int_to_ptr.vmem [resolvable:$true] %s166_s11 }
  0x13   :  { %107 = vmatpush.msra.mxu0 %v82_v4 }
  0x14   :  { %139 = vmatpush.msra.mxu1 %v115_v8 }
  0x15   :  { %108 = vmatpush.msra.mxu0 %v81_v5 }
  0x16   :  { %181 = vmatmul.msk.f32.vlgmr.msra.gmra.mxu0 %vm78_vm0, %v80_v6  ;;  %140 = vmatpush.msra.mxu1 %v114_v9  ;;  %v145_v16 = vld [vmem:[#allocation2] sm:$0xff] }
  0x93   :  { %v110_v11 = vpop.f32.mrf.mxu0 }
  0x94   :  { %v111_v12 = vadd.f32 %v190_v10, %v110_v11 }
  0x96   :  { %v113_v13 = vmax.f32 %v111_v12, 0.0 }
  0x98   :  { %182 = vmatmul.msk.f32.vlgmr.msra.gmra.mxu1 %vm78_vm0, %v113_v13 }
 0x115   :  { %v142_v15 = vpop.f32.mrf.mxu1 }
 0x116   :  { %v143_v17 = vadd.f32 %v191_v14, %v142_v15 }
 0x118   :  { %v146_v18 = vmax.f32 %v145_v16, %v143_v17 }
 0x11a   :  { %147 = vst.msk [vmem:[#allocation2] sm:$0xff] %vm78_vm0, %v146_v18 }
 0x121   :  { %v151_v19 = vld [vmem:[#allocation2] sm:$0xff] }
 0x122   :  { %v152_v20 = vsel %vm78_vm0, %v151_v19, -inf }
 0x123   :  { %v153_v21 = vrot.slane %v152_v20, 4 }
 0x125   :  { %v154_v22 = vmax.f32 %v152_v20, %v153_v21 }
 0x127   :  { %v155_v23 = vrot.slane %v154_v22, 2 }
 0x129   :  { %v156_v24 = vmax.f32 %v154_v22, %v155_v23 }
 0x12b   :  { %v157_v25 = vrot.slane %v156_v24, 1 }
 0x12d   :  { %v158_v26 = vmax.f32 %v156_v24, %v157_v25 }
 0x12f   :  { %160 = vst.msk [vmem:[#allocation9] sm:$0x1] %vm159_vm1, %v158_v26 }
 0x130   :  { %171 = dma.vmem_to_hbm [thread:$0]  %s167_s11, 16, %s169_s14, [#allocation5]  }
 0x131   :  { %292 = dma.done.wait [#allocation5], 16  }
 0x132   :  { %293 = vsyncadd [#allocation5], 4294967280 }
 0x133   :  { %176 = vsyncpa [#allocation4], 1 }
 0x134   :  { %177 = vsyncpa [#allocation7], 1 }
 0x135   :  { %178 = vsyncpa [#allocation5], 1 }

</bundles_post_ra>
